<compile_context>
chip_gen: v6e
topology: v6e:2x2x1
jax: 0.10.0
libtpu: 0.0.40
codegen_flags: <defaults>
</compile_context>

<pallas_src>
import math

import jax
import jax.numpy as jnp
from jax.experimental import pallas as pl
from jax.experimental.pallas import tpu as pltpu


def _round_up(x, m):
    return ((x + m - 1) // m) * m


# ---------------------------------------------------------------------------
# Pallas kernel: fused 4-layer MLP (conv-mean already folded into w1/b1)
# ---------------------------------------------------------------------------
def fused_mlp_kernel(x_ref, w1_ref, b1_ref, w2_ref, b2_ref, w3_ref, b3_ref,
                     w4_ref, b4_ref, out_ref):
    h = jnp.maximum(
        jnp.dot(x_ref[...], w1_ref[...], preferred_element_type=jnp.float32) + b1_ref[...], 0.0)
    h = jnp.maximum(
        jnp.dot(h, w2_ref[...], preferred_element_type=jnp.float32) + b2_ref[...], 0.0)
    h = jnp.maximum(
        jnp.dot(h, w3_ref[...], preferred_element_type=jnp.float32) + b3_ref[...], 0.0)
    out_ref[...] = jnp.dot(h, w4_ref[...], preferred_element_type=jnp.float32) + b4_ref[...]


def fused_mlp(x, fold, *, tile_b):
    """x: (B_pad, F_pad) -> (B_pad, 128). Real output is column 0."""
    Bp, Fp = x.shape
    assert Bp % tile_b == 0
    n_tiles = Bp // tile_b
    out_cols = fold["w4"].shape[1]

    def const(arr):  # whole-array, VMEM-resident across grid iterations
        return pl.BlockSpec(arr.shape, lambda i: (0, 0))

    return pl.pallas_call(
        fused_mlp_kernel,
        out_shape=jax.ShapeDtypeStruct((Bp, out_cols), jnp.float32),
        grid=(n_tiles,),
        in_specs=[
            pl.BlockSpec((tile_b, Fp), lambda i: (i, 0)),
            const(fold["w1"]), const(fold["b1"]),
            const(fold["w2"]), const(fold["b2"]),
            const(fold["w3"]), const(fold["b3"]),
            const(fold["w4"]), const(fold["b4"]),
        ],
        out_specs=pl.BlockSpec((tile_b, out_cols), lambda i: (i, 0)),
        compiler_params=pltpu.CompilerParams(dimension_semantics=("parallel",)),
    )(x, fold["w1"], fold["b1"], fold["w2"], fold["b2"],
      fold["w3"], fold["b3"], fold["w4"], fold["b4"])


# ---------------------------------------------------------------------------
# Init-time precompute: fold Conv2d(1->32,3,pad=1)+spatial-mean into layer 1
# ---------------------------------------------------------------------------
def fold_params(params, *, n_agents, node_input_dim, G,
                feat_align=128, out_pad=128):
    N, D = n_agents, node_input_dim
    H2 = params["w1"].shape[1]

    # (G*G, 32) matrix M such that conv_mean(x)[c] = sum_g x_flat[g]*M[g,c] + conv_b[c]
    w = params["conv_w"][:, 0]                                   # (32, 3, 3)
    idx = jnp.arange(G)
    M = jnp.zeros((G, G, 32), jnp.float32)
    for ki in range(3):
        rok = ((idx >= ki - 1) & (idx <= G + ki - 2)).astype(jnp.float32)   # (G,)
        for kj in range(3):
            cok = ((idx >= kj - 1) & (idx <= G + kj - 2)).astype(jnp.float32)
            M = M + (rok[:, None] * cok[None, :])[:, :, None] * w[:, ki, kj][None, None, :]
    M = M.reshape(G * G, 32) / float(G * G)

    w1 = params["w1"]
    w1_obs = w1[: N * D]                                          # (N*D, 2H)
    w1_vis = w1[N * D: N * D + N * 32].reshape(N, 32, H2)         # (N, 32, 2H)
    w1_sent = w1[N * D + N * 32:]                                 # (S, 2H)

    w_grid = jnp.einsum("gc,nch->ngh", M, w1_vis).reshape(N * G * G, H2)
    b1_eff = params["b1"] + jnp.einsum("c,nch->h", params["conv_b"][0], w1_vis)[None, :]

    w1_eff = jnp.concatenate([w1_obs, w_grid, w1_sent], axis=0)   # (F, 2H)
    F = w1_eff.shape[0]
    Fpad = _round_up(F, feat_align)
    w1_eff = jnp.pad(w1_eff, ((0, Fpad - F), (0, 0)))

    # Lane-dense final store: pad output dim 1 -> 128 with zero columns.
    w4 = jnp.pad(params["w4"], ((0, 0), (0, out_pad - params["w4"].shape[1])))
    b4 = jnp.pad(params["b4"], ((0, 0), (0, out_pad - params["b4"].shape[1])))

    return dict(w1=w1_eff, b1=b1_eff, w2=params["w2"], b2=params["b2"],
                w3=params["w3"], b3=params["b3"], w4=w4, b4=b4,
                feat_dim=F, feat_pad=Fpad)


# ---------------------------------------------------------------------------
# Forward wrapper (matches the PyTorch module semantics)
# ---------------------------------------------------------------------------
def simple_concat_critic_forward(fold, obs, grid_obs, sent_emb, *, n_agents):
    B, N, D = obs.shape
    G = grid_obs.shape[-1]

    flat_obs = obs.reshape(B, N * D)
    flat_grid = grid_obs.reshape(B, N * G * G)
    sent = sent_emb[..., 0, :]
    x = jnp.concatenate([flat_obs, flat_grid, sent], axis=-1)     # (B, F)

    F = x.shape[1]
    assert F == fold["feat_dim"]
    tile_b = min(_round_up(B, 8), 256)
    Bpad = _round_up(B, tile_b)
    x = jnp.pad(x, ((0, Bpad - B), (0, fold["feat_pad"] - F)))    # (Bpad, Fpad)

    out = fused_mlp(x, fold, tile_b=tile_b)                       # (Bpad, 128)
    v = out[:B, 0:1]                                              # (B, 1)
    # unsqueeze(-2) + expand over agents -> (B, N, 1)
    return jnp.broadcast_to(v[:, None, :], (B, n_agents, v.shape[-1]))


# ---------------------------------------------------------------------------
# Parameter init (PyTorch-default-like uniform(-1/sqrt(fan_in), ...))
# ---------------------------------------------------------------------------
def init_params(key, *, n_agents, node_input_dim, sentence_dim, hidden_dim):
    flat_dim = n_agents * (node_input_dim + 32) + sentence_dim
    ks = jax.random.split(key, 10)

    def linear(kw, kb, fi, fo):
        bound = 1.0 / math.sqrt(fi)
        w = jax.random.uniform(kw, (fi, fo), jnp.float32, -bound, bound)
        b = jax.random.uniform(kb, (1, fo), jnp.float32, -bound, bound)
        return w, b

    w1, b1 = linear(ks[0], ks[1], flat_dim, hidden_dim * 2)
    w2, b2 = linear(ks[2], ks[3], hidden_dim * 2, hidden_dim * 2)
    w3, b3 = linear(ks[4], ks[5], hidden_dim * 2, hidden_dim)
    w4, b4 = linear(ks[6], ks[7], hidden_dim, 1)

    cbound = 1.0 / math.sqrt(1 * 3 * 3)
    conv_w = jax.random.uniform(ks[8], (32, 1, 3, 3), jnp.float32, -cbound, cbound)  # OIHW
    conv_b = jax.random.uniform(ks[9], (1, 32), jnp.float32, -cbound, cbound)

    return dict(w1=w1, b1=b1, w2=w2, b2=b2, w3=w3, b3=b3, w4=w4, b4=b4,
                conv_w=conv_w, conv_b=conv_b)


# ---------------------------------------------------------------------------
# Pure-JAX reference (mirrors the PyTorch forward) for a correctness check
# ---------------------------------------------------------------------------
def reference_forward(params, obs, grid_obs, sent_emb, *, n_agents):
    B, N, D = obs.shape
    G = grid_obs.shape[-1]
    hp = jax.lax.Precision.HIGHEST

    flat_obs = obs.reshape(B, N * D)
    batch_grid = grid_obs.reshape(B * N, 1, G, G)
    conv = jax.lax.conv_general_dilated(
        batch_grid, params["conv_w"], (1, 1), "SAME",
        dimension_numbers=("NCHW", "OIHW", "NCHW"), precision=hp)
    conv = conv + params["conv_b"].reshape(1, 32, 1, 1)
    visits = conv.mean(axis=(-2, -1))                             # (B*N, 32)
    flat_visits = visits.reshape(B, N * 32)
    sent = sent_emb[..., 0, :]
    x = jnp.concatenate([flat_obs, flat_visits, sent], axis=-1)

    h = jnp.maximum(jnp.dot(x, params["w1"], precision=hp) + params["b1"], 0.0)
    h = jnp.maximum(jnp.dot(h, params["w2"], precision=hp) + params["b2"], 0.0)
    h = jnp.maximum(jnp.dot(h, params["w3"], precision=hp) + params["b3"], 0.0)
    v = jnp.dot(h, params["w4"], precision=hp) + params["b4"]
    return jnp.broadcast_to(v[:, None, :], (B, n_agents, v.shape[-1]))


# ---------------------------------------------------------------------------
if __name__ == "__main__":
    B, N, D, G, S_DIM, SEQ, H = 2, 3, 6, 8, 16, 4, 32

    k_obs, k_grid, k_sent = jax.random.split(jax.random.PRNGKey(0), 3)
    obs = jax.random.normal(k_obs, (B, N, D), jnp.float32)
    grid_obs = jax.random.normal(k_grid, (B, N, G, G), jnp.float32)
    sent_emb = jax.random.normal(k_sent, (B, SEQ, S_DIM), jnp.float32)

    params = init_params(jax.random.PRNGKey(42), n_agents=N, node_input_dim=D,
                         sentence_dim=S_DIM, hidden_dim=H)
    fold = fold_params(params, n_agents=N, node_input_dim=D, G=G)

    out = simple_concat_critic_forward(fold, obs, grid_obs, sent_emb, n_agents=N)
    out = jax.block_until_ready(out)

    ref = reference_forward(params, obs, grid_obs, sent_emb, n_agents=N)
    assert out.shape == (B, N, 1), out.shape
    assert bool(jnp.all(jnp.isfinite(out)))
    assert bool(jnp.allclose(out, ref, atol=2e-3, rtol=2e-3)), (out, ref)

    print("KERNEL_OK")
</pallas_src>

<mosaic_0001>
module attributes {stable_mosaic.version = 11 : i64} {
  func.func @fused_mlp_kernel(%arg0: i32, %arg1: memref<8x256xf32, #tpu.memory_space<vmem>>, %arg2: memref<256x64xf32, #tpu.memory_space<vmem>>, %arg3: memref<1x64xf32, #tpu.memory_space<vmem>>, %arg4: memref<64x64xf32, #tpu.memory_space<vmem>>, %arg5: memref<1x64xf32, #tpu.memory_space<vmem>>, %arg6: memref<64x32xf32, #tpu.memory_space<vmem>>, %arg7: memref<1x32xf32, #tpu.memory_space<vmem>>, %arg8: memref<32x128xf32, #tpu.memory_space<vmem>>, %arg9: memref<1x128xf32, #tpu.memory_space<vmem>>, %arg10: memref<8x128xf32, #tpu.memory_space<vmem>>) attributes {dimension_semantics = [#tpu.dimension_semantics<parallel>], iteration_bounds = array<i64: 1>, scalar_prefetch = 0 : i64, scratch_operands = 0 : i64, tpu.core_type = #tpu.core_type<tc>, window_params = [{transform_indices = @transform_0, window_bounds = array<i64: 8, 256>}, {pipeline_mode = #tpu.pipeline_mode<synchronous>, transform_indices = @transform_1, window_bounds = array<i64: 256, 64>}, {pipeline_mode = #tpu.pipeline_mode<synchronous>, transform_indices = @transform_2, window_bounds = array<i64: 1, 64>}, {pipeline_mode = #tpu.pipeline_mode<synchronous>, transform_indices = @transform_3, window_bounds = array<i64: 64, 64>}, {pipeline_mode = #tpu.pipeline_mode<synchronous>, transform_indices = @transform_4, window_bounds = array<i64: 1, 64>}, {pipeline_mode = #tpu.pipeline_mode<synchronous>, transform_indices = @transform_5, window_bounds = array<i64: 64, 32>}, {pipeline_mode = #tpu.pipeline_mode<synchronous>, transform_indices = @transform_6, window_bounds = array<i64: 1, 32>}, {pipeline_mode = #tpu.pipeline_mode<synchronous>, transform_indices = @transform_7, window_bounds = array<i64: 32, 128>}, {pipeline_mode = #tpu.pipeline_mode<synchronous>, transform_indices = @transform_8, window_bounds = array<i64: 1, 128>}, {transform_indices = @transform_9, window_bounds = array<i64: 8, 128>}]} {
    %c0 = arith.constant 0 : index
    %c0_0 = arith.constant 0 : index
    %0 = vector.load %arg1[%c0, %c0_0] : memref<8x256xf32, #tpu.memory_space<vmem>>, vector<8x256xf32>
    %c0_1 = arith.constant 0 : index
    %c0_2 = arith.constant 0 : index
    %1 = vector.load %arg2[%c0_1, %c0_2] : memref<256x64xf32, #tpu.memory_space<vmem>>, vector<256x64xf32>
    %cst = arith.constant dense<0.000000e+00> : vector<8x64xf32>
    %2 = tpu.matmul %0, %1, %cst {dimension_numbers = #tpu.dot_dimension_numbers<[1], [0], [0], [1], [0, 0, 1, 1], [], []>} : vector<8x256xf32>, vector<256x64xf32>, vector<8x64xf32> -> vector<8x64xf32>
    %c0_3 = arith.constant 0 : index
    %c0_4 = arith.constant 0 : index
    %3 = vector.load %arg3[%c0_3, %c0_4] : memref<1x64xf32, #tpu.memory_space<vmem>>, vector<1x64xf32>
    %4 = vector.broadcast %3 : vector<1x64xf32> to vector<8x64xf32>
    %5 = arith.addf %2, %4 : vector<8x64xf32>
    %cst_5 = arith.constant 0.000000e+00 : f32
    %6 = vector.broadcast %cst_5 : f32 to vector<8x64xf32>
    %7 = arith.maximumf %5, %6 : vector<8x64xf32>
    %c0_6 = arith.constant 0 : index
    %c0_7 = arith.constant 0 : index
    %8 = vector.load %arg4[%c0_6, %c0_7] : memref<64x64xf32, #tpu.memory_space<vmem>>, vector<64x64xf32>
    %cst_8 = arith.constant dense<0.000000e+00> : vector<8x64xf32>
    %9 = tpu.matmul %7, %8, %cst_8 {dimension_numbers = #tpu.dot_dimension_numbers<[1], [0], [0], [1], [0, 0, 1, 1], [], []>} : vector<8x64xf32>, vector<64x64xf32>, vector<8x64xf32> -> vector<8x64xf32>
    %c0_9 = arith.constant 0 : index
    %c0_10 = arith.constant 0 : index
    %10 = vector.load %arg5[%c0_9, %c0_10] : memref<1x64xf32, #tpu.memory_space<vmem>>, vector<1x64xf32>
    %11 = vector.broadcast %10 : vector<1x64xf32> to vector<8x64xf32>
    %12 = arith.addf %9, %11 : vector<8x64xf32>
    %cst_11 = arith.constant 0.000000e+00 : f32
    %13 = vector.broadcast %cst_11 : f32 to vector<8x64xf32>
    %14 = arith.maximumf %12, %13 : vector<8x64xf32>
    %c0_12 = arith.constant 0 : index
    %c0_13 = arith.constant 0 : index
    %15 = vector.load %arg6[%c0_12, %c0_13] : memref<64x32xf32, #tpu.memory_space<vmem>>, vector<64x32xf32>
    %cst_14 = arith.constant dense<0.000000e+00> : vector<8x32xf32>
    %16 = tpu.matmul %14, %15, %cst_14 {dimension_numbers = #tpu.dot_dimension_numbers<[1], [0], [0], [1], [0, 0, 1, 1], [], []>} : vector<8x64xf32>, vector<64x32xf32>, vector<8x32xf32> -> vector<8x32xf32>
    %c0_15 = arith.constant 0 : index
    %c0_16 = arith.constant 0 : index
    %17 = vector.load %arg7[%c0_15, %c0_16] : memref<1x32xf32, #tpu.memory_space<vmem>>, vector<1x32xf32>
    %18 = vector.broadcast %17 : vector<1x32xf32> to vector<8x32xf32>
    %19 = arith.addf %16, %18 : vector<8x32xf32>
    %cst_17 = arith.constant 0.000000e+00 : f32
    %20 = vector.broadcast %cst_17 : f32 to vector<8x32xf32>
    %21 = arith.maximumf %19, %20 : vector<8x32xf32>
    %c0_18 = arith.constant 0 : index
    %c0_19 = arith.constant 0 : index
    %22 = vector.load %arg8[%c0_18, %c0_19] : memref<32x128xf32, #tpu.memory_space<vmem>>, vector<32x128xf32>
    %cst_20 = arith.constant dense<0.000000e+00> : vector<8x128xf32>
    %23 = tpu.matmul %21, %22, %cst_20 {dimension_numbers = #tpu.dot_dimension_numbers<[1], [0], [0], [1], [0, 0, 1, 1], [], []>} : vector<8x32xf32>, vector<32x128xf32>, vector<8x128xf32> -> vector<8x128xf32>
    %c0_21 = arith.constant 0 : index
    %c0_22 = arith.constant 0 : index
    %24 = vector.load %arg9[%c0_21, %c0_22] : memref<1x128xf32, #tpu.memory_space<vmem>>, vector<1x128xf32>
    %25 = vector.broadcast %24 : vector<1x128xf32> to vector<8x128xf32>
    %26 = arith.addf %23, %25 : vector<8x128xf32>
    %c0_23 = arith.constant 0 : index
    %c0_24 = arith.constant 0 : index
    %27 = vector.load %arg10[%c0_23, %c0_24] : memref<8x128xf32, #tpu.memory_space<vmem>>, vector<8x128xf32>
    tpu.vector_store %arg10[%c0_23, %c0_24], %26 {strides = array<i32>} : memref<8x128xf32, #tpu.memory_space<vmem>>, vector<8x128xf32>,
    return
  }
  func.func @transform_0(%arg0: i32) -> (i32, i32) {
    %c0_i32 = arith.constant 0 : i32
    %c0_i32_0 = arith.constant 0 : i32
    return %arg0, %c0_i32 : i32, i32
  }
  func.func @transform_1(%arg0: i32) -> (i32, i32) {
    %c0_i32 = arith.constant 0 : i32
    %c0_i32_0 = arith.constant 0 : i32
    %c0_i32_1 = arith.constant 0 : i32
    return %c0_i32, %c0_i32_0 : i32, i32
  }
  func.func @transform_2(%arg0: i32) -> (i32, i32) {
    %c0_i32 = arith.constant 0 : i32
    %c0_i32_0 = arith.constant 0 : i32
    %c0_i32_1 = arith.constant 0 : i32
    return %c0_i32, %c0_i32_0 : i32, i32
  }
  func.func @transform_3(%arg0: i32) -> (i32, i32) {
    %c0_i32 = arith.constant 0 : i32
    %c0_i32_0 = arith.constant 0 : i32
    %c0_i32_1 = arith.constant 0 : i32
    return %c0_i32, %c0_i32_0 : i32, i32
  }
  func.func @transform_4(%arg0: i32) -> (i32, i32) {
    %c0_i32 = arith.constant 0 : i32
    %c0_i32_0 = arith.constant 0 : i32
    %c0_i32_1 = arith.constant 0 : i32
    return %c0_i32, %c0_i32_0 : i32, i32
  }
  func.func @transform_5(%arg0: i32) -> (i32, i32) {
    %c0_i32 = arith.constant 0 : i32
    %c0_i32_0 = arith.constant 0 : i32
    %c0_i32_1 = arith.constant 0 : i32
    return %c0_i32, %c0_i32_0 : i32, i32
  }
  func.func @transform_6(%arg0: i32) -> (i32, i32) {
    %c0_i32 = arith.constant 0 : i32
    %c0_i32_0 = arith.constant 0 : i32
    %c0_i32_1 = arith.constant 0 : i32
    return %c0_i32, %c0_i32_0 : i32, i32
  }
  func.func @transform_7(%arg0: i32) -> (i32, i32) {
    %c0_i32 = arith.constant 0 : i32
    %c0_i32_0 = arith.constant 0 : i32
    %c0_i32_1 = arith.constant 0 : i32
    return %c0_i32, %c0_i32_0 : i32, i32
  }
  func.func @transform_8(%arg0: i32) -> (i32, i32) {
    %c0_i32 = arith.constant 0 : i32
    %c0_i32_0 = arith.constant 0 : i32
    %c0_i32_1 = arith.constant 0 : i32
    return %c0_i32, %c0_i32_0 : i32, i32
  }
  func.func @transform_9(%arg0: i32) -> (i32, i32) {
    %c0_i32 = arith.constant 0 : i32
    %c0_i32_0 = arith.constant 0 : i32
    return %arg0, %c0_i32 : i32, i32
  }
}

</mosaic_0001>

<bundles_post_ra>
// kernel: tpu_custom_call.1
= control target key start
LH: loop header
LB: loop body
LE: loop exit
PB: predicated region body
PF: predicated region fallthrough
CT: control target
= control target key end

     0   :  { %v563_v4 = vmov 0.0   ;;  %s818_s0 = inlined_call_operand.vmem [shape: f32[8,256], index: 0, kind: input, shape index: {}]   ;;  %s819_s1 = inlined_call_operand.vmem [shape: f32[256,64], index: 1, kind: input, shape index: {}]   ;;  %s820_s2 = inlined_call_operand.vmem [shape: f32[1,64], index: 2, kind: input, shape index: {}]   ;;  %s821_s3 = inlined_call_operand.vmem [shape: f32[64,64], index: 3, kind: input, shape index: {}]   ;;  %s822_s4 = inlined_call_operand.vmem [shape: f32[1,64], index: 4, kind: input, shape index: {}]   ;;  %s823_s5 = inlined_call_operand.vmem [shape: f32[64,32], index: 5, kind: input, shape index: {}]   ;;  %s824_s6 = inlined_call_operand.vmem [shape: f32[1,32], index: 6, kind: input, shape index: {}]   ;;  %s825_s7 = inlined_call_operand.vmem [shape: f32[32,128], index: 7, kind: input, shape index: {}]   ;;  %s826_s8 = inlined_call_operand.vmem [shape: f32[1,128], index: 8, kind: input, shape index: {}]   ;;  %s827_s9 = inlined_call_operand.hbm [shape: f32[8,128], index: 9, kind: output, shape index: {}]  }
   0x1   :  { %v66_v0 = vld [vmem:[%s819_s1 + $0xf8] sm:$0xff]  ;;  %v65_v2 = vld [vmem:[%s819_s1 + $0xf0] sm:$0xff]  ;;  %489 = vmatprep.subr.mxu1 %v563_v4  ;;  %v64_v5 = vld [vmem:[%s819_s1 + $0xe8] sm:$0xff] }
   0x2   :  { %v50_v1 = vld [vmem:[%s819_s1 + $0x78] sm:$0xff]  ;;  %431 = vmatprep.subr.mxu0 %v66_v0  ;;  %v49_v3 = vld [vmem:[%s819_s1 + $0x70] sm:$0xff]  ;;  %v48_v6 = vld [vmem:[%s819_s1 + $0x68] sm:$0xff] }
   0x3   :  { %432 = vmatpush3.msra.mxu0 %v50_v1  ;;  %v63_v7 = vld [vmem:[%s819_s1 + $0xe0] sm:$0xff]  ;;  %v62_v9 = vld [vmem:[%s819_s1 + $0xd8] sm:$0xff]  ;;  %v61_v11 = vld [vmem:[%s819_s1 + $0xd0] sm:$0xff] }
   0x4   :  { %433 = vmatprep.subr.mxu0 %v65_v2  ;;  %v47_v8 = vld [vmem:[%s819_s1 + $0x60] sm:$0xff]  ;;  %v46_v10 = vld [vmem:[%s819_s1 + $0x58] sm:$0xff]  ;;  %v45_v12 = vld [vmem:[%s819_s1 + $0x50] sm:$0xff] }
   0x5   :  { %434 = vmatpush3.msra.mxu0 %v49_v3  ;;  %v60_v13 = vld [vmem:[%s819_s1 + $0xc8] sm:$0xff]  ;;  %v152_v16 = vld [vmem:[%s821_s3 + $0x38] sm:$0xff]  ;;  %v151_v17 = vld [vmem:[%s821_s3 + $0x30] sm:$0xff] }
   0x6   :  { %435 = vmatprep.subr.mxu0 %v64_v5  ;;  %v34_v14 = vld [vmem:[%s818_s0 + $0x8] sm:$0xff]  ;;  %v59_v18 = vld [vmem:[%s819_s1 + $0xc0] sm:$0xff]  ;;  %490 = vmatpush3.msra.mxu1 %v152_v16 }
   0x7   :  { %436 = vmatpush3.msra.mxu0 %v48_v6  ;;  %v44_v15 = vld [vmem:[%s819_s1 + $0x48] sm:$0xff]  ;;  %138 = vmatprep.mubr.f32.mxu0 %v34_v14 }
   0x8   :  { %437 = vmatprep.subr.mxu0 %v63_v7 }
   0x9   :  { %438 = vmatpush3.msra.mxu0 %v47_v8 }
   0xa   :  { %439 = vmatprep.subr.mxu0 %v62_v9 }
   0xb   :  { %440 = vmatpush3.msra.mxu0 %v46_v10 }
   0xc   :  { %441 = vmatprep.subr.mxu0 %v61_v11 }
   0xd   :  { %442 = vmatpush3.msra.mxu0 %v45_v12 }
   0xe   :  { %14 = vsyncpa [#allocation3], 0  ;;  %443 = vmatprep.subr.mxu0 %v60_v13  ;;  %v43_v19 = vld [vmem:[%s819_s1 + $0x40] sm:$0xff]  ;;  %491 = vmatprep.subr.mxu1 %v563_v4  ;;  %v150_v20 = vld [vmem:[%s821_s3 + $0x28] sm:$0xff]  ;;  %vm564_vm0 = vmmov 0   ;;  %vm160_vm1 = vcmask 523264  }
   0xf   :  { %444 = vmatpush3.msra.mxu0 %v44_v15  ;;  %v58_v21 = vld [vmem:[%s819_s1 + $0xb8] sm:$0xff]  ;;  %492 = vmatpush3.msra.mxu1 %v151_v17  ;;  %v57_v23 = vld [vmem:[%s819_s1 + $0xb0] sm:$0xff]  ;;  %v56_v25 = vld [vmem:[%s819_s1 + $0xa8] sm:$0xff]  ;;  %vm335_vm2 = vcmask 261120   ;;  %s565_s11 = smov [#allocation2]  }
  0x10   :  { %445 = vmatprep.subr.mxu0 %v59_v18  ;;  %v42_v22 = vld [vmem:[%s819_s1 + $0x38] sm:$0xff]  ;;  %493 = vmatprep.subr.mxu1 %v563_v4  ;;  %v41_v24 = vld [vmem:[%s819_s1 + $0x30] sm:$0xff]  ;;  %v40_v26 = vld [vmem:[%s819_s1 + $0x28] sm:$0xff] }
  0x11   :  { %446 = vmatpush3.msra.mxu0 %v43_v19  ;;  %494 = vmatpush3.msra.mxu1 %v150_v20  ;;  %v55_v27 = vld [vmem:[%s819_s1 + $0xa0] sm:$0xff]  ;;  %v54_v29 = vld [vmem:[%s819_s1 + $0x98] sm:$0xff]  ;;  %v53_v31 = vld [vmem:[%s819_s1 + $0x90] sm:$0xff] }
  0x12   :  { %447 = vmatprep.subr.mxu0 %v58_v21  ;;  %495 = vmatprep.subr.mxu1 %v563_v4  ;;  %v39_v28 = vld [vmem:[%s819_s1 + $0x20] sm:$0xff]  ;;  %v38_v30 = vld [vmem:[%s819_s1 + $0x18] sm:$0xff]  ;;  %v37_v32 = vld [vmem:[%s819_s1 + $0x10] sm:$0xff] }
  0x13   :  { %448 = vmatpush3.msra.mxu0 %v42_v22  ;;  %v52_v33 = vld [vmem:[%s819_s1 + $0x88] sm:$0xff]  ;;  %v51_v35 = vld [vmem:[%s819_s1 + $0x80] sm:$0xff]  ;;  %v148_v39 = vld [vmem:[%s821_s3 + $0x18] sm:$0xff]  ;;  %505 = vmatprep.mubr.msk.f32.mxu1 %vm564_vm0, %v563_v4 }
  0x14   :  { %449 = vmatprep.subr.mxu0 %v57_v23  ;;  %v36_v34 = vld [vmem:[%s819_s1 + $0x8] sm:$0xff]  ;;  %v35_v36 = vld [vmem:[%s819_s1] sm:$0xff]  ;;  %v147_v40 = vld [vmem:[%s821_s3 + $0x10] sm:$0xff] }
  0x15   :  { %450 = vmatpush3.msra.mxu0 %v41_v24  ;;  %v33_v37 = vld [vmem:[%s818_s0] sm:$0xff]  ;;  %v146_v41 = vld [vmem:[%s821_s3 + $0x8] sm:$0xff]  ;;  %v242_v49 = vld [vmem:[%s823_s5 + $0x38] sm:$0xff] }
  0x16   :  { %451 = vmatprep.subr.mxu0 %v56_v25  ;;  %v149_v38 = vld [vmem:[%s821_s3 + $0x20] sm:$0xff]  ;;  %v241_v50 = vld [vmem:[%s823_s5 + $0x30] sm:$0xff]  ;;  %v240_v51 = vld [vmem:[%s823_s5 + $0x28] sm:$0xff] }
  0x17   :  { %452 = vmatpush3.msra.mxu0 %v40_v26  ;;  %496 = vmatpush3.msra.mxu1 %v149_v38  ;;  %v145_v42 = vld [vmem:[%s821_s3] sm:$0xff]  ;;  %v238_v53 = vld [vmem:[%s823_s5 + $0x18] sm:$0xff]  ;;  %v237_v54 = vld [vmem:[%s823_s5 + $0x10] sm:$0xff] }
  0x18   :  { %453 = vmatprep.subr.mxu0 %v55_v27  ;;  %497 = vmatprep.subr.mxu1 %v563_v4  ;;  %v424_v44 = vld [vmem:[%s820_s2] ss:$0 sm:$0xff]  ;;  %v236_v55 = vld [vmem:[%s823_s5 + $0x8] sm:$0xff]  ;;  %v327_v57 = vld [vmem:[%s825_s7 + $0x18] sm:$0xff]  ;;  %s416_s2 = sshll.u32 %s565_s11, 4  ;;  %s417_s2 = int_to_ptr.vmem [resolvable:$true] %s416_s2 }
  0x19   :  { %454 = vmatpush3.msra.mxu0 %v39_v28  ;;  %498 = vmatpush3.msra.mxu1 %v148_v39  ;;  %v239_v52 = vld [vmem:[%s823_s5 + $0x20] sm:$0xff]  ;;  %v326_v63 = vld [vmem:[%s825_s7 + $0x10] sm:$0xff]  ;;  %v325_v0 = vld [vmem:[%s825_s7 + $0x8] sm:$0xff]  ;;  %p546_p1 = scmp.lt.s32.totalorder %s417_s2, %s417_s2 }
  0x1a   :  { %455 = vmatprep.subr.mxu0 %v54_v29  ;;  %499 = vmatprep.subr.mxu1 %v563_v4  ;;  %v235_v56 = vld [vmem:[%s823_s5] sm:$0xff] }
  0x1b   :  { %456 = vmatpush3.msra.mxu0 %v38_v30  ;;  %500 = vmatpush3.msra.mxu1 %v147_v40  ;;  %v425_v58 = vld [vmem:[%s822_s4] ss:$0 sm:$0xff] }
  0x1c   :  { %457 = vmatprep.subr.mxu0 %v53_v31  ;;  %501 = vmatprep.subr.mxu1 %v563_v4  ;;  %v324_v1 = vld [vmem:[%s825_s7] sm:$0xff]  ;;  %s541_s7 = scalar_lea.vmem %s417_s2, 128 }
  0x1d   :  { %458 = vmatpush3.msra.mxu0 %v37_v32  ;;  %502 = vmatpush3.msra.mxu1 %v146_v41  ;;  %v427_v2 = vld [vmem:[%s824_s6] ss:$0 sm:$0xff]  ;;  %p542_p0 = scmp.ne.s32.totalorder %s417_s2, %s541_s7  ;;  %p547_p2 = scmp.lt.s32.totalorder %s541_s7, %s541_s7 }
  0x1e   :  { %459 = vmatprep.subr.mxu0 %v52_v33  ;;  %503 = vmatprep.subr.mxu1 %v563_v4  ;;  %v429_v8 = vld [vmem:[%s826_s8] ss:$0 sm:$0xff] }
  0x1f   :  { %460 = vmatpush3.msra.mxu0 %v36_v34  ;;  %504 = vmatpush3.msra.mxu1 %v145_v42  ;;  %p548_p3 = por %p547_p2, %p546_p1 }
  0x20   :  { %461 = vmatprep.subr.mxu0 %v51_v35  ;;  %508 = vmatprep.subr.mxu1 %v563_v4 }
  0x21   :  { %462 = vmatpush3.msra.mxu0 %v35_v36  ;;  %p549_p4 = pnand %p548_p3, %p542_p0 }
  0x22   :  { %139 = vmatmul.mubr.f32.vlgmr.msra.gmra.mxu0 %v33_v37  ;;  %527 = vmatprep.subr.mxu0 %v563_v4 }
  0x23   :  { %535 = vmatprep.mubr.msk.f32.mxu0 %vm564_vm0, %v563_v4  ;;  %528 = vmatpush3.msra.mxu0 %v327_v57 }
  0x24   :  { %529 = vmatprep.subr.mxu0 %v563_v4 }
  0x25   :  { %530 = vmatpush3.msra.mxu0 %v326_v63 }
  0x26   :  { %531 = vmatprep.subr.mxu0 %v563_v4 }
  0x27   :  { %532 = vmatpush3.msra.mxu0 %v325_v0 }
  0x28   :  { %533 = vmatprep.subr.mxu0 %v563_v4 }
  0x29   :  { %534 = vmatpush3.msra.mxu0 %v324_v1 }
  0xe2   :  { %v463_v43 = vpop.f32.mrf.mxu0 }
  0xe4   :  { %v464_v45 = vpop.f32.mrf.mxu0 }
  0xe5   :  { %v465_v46 = vadd.f32 %v464_v45, %v463_v43 }
  0xe7   :  { %v141_v47 = vadd.f32 %v465_v46, %v424_v44 }
  0xe9   :  { %v144_v48 = vmax.f32 %v141_v47, 0.0 }
  0xeb   :  { %506 = vmatmul.mubr.msk.f32.vlgmr.msra.gmra.mxu1 %vm160_vm1, %v144_v48 }
  0xec   :  { %509 = vmatpush3.msra.mxu1 %v242_v49  ;;  %524 = vmatprep.mubr.msk.f32.mxu1 %vm564_vm0, %v563_v4 }
  0xed   :  { %510 = vmatprep.subr.mxu1 %v563_v4 }
  0xee   :  { %511 = vmatpush3.msra.mxu1 %v241_v50 }
  0xef   :  { %512 = vmatprep.subr.mxu1 %v563_v4 }
  0xf0   :  { %513 = vmatpush3.msra.mxu1 %v240_v51 }
  0xf1   :  { %514 = vmatprep.subr.mxu1 %v563_v4 }
  0xf2   :  { %515 = vmatpush3.msra.mxu1 %v239_v52 }
  0xf3   :  { %516 = vmatprep.subr.mxu1 %v563_v4 }
  0xf4   :  { %517 = vmatpush3.msra.mxu1 %v238_v53 }
  0xf5   :  { %518 = vmatprep.subr.mxu1 %v563_v4 }
  0xf6   :  { %519 = vmatpush3.msra.mxu1 %v237_v54 }
  0xf7   :  { %520 = vmatprep.subr.mxu1 %v563_v4 }
  0xf8   :  { %521 = vmatpush3.msra.mxu1 %v236_v55 }
  0xf9   :  { %522 = vmatprep.subr.mxu1 %v563_v4 }
  0xfa   :  { %523 = vmatpush3.msra.mxu1 %v235_v56 }
 0x1ab   :  { %v230_v59 = vpop.f32.mrf.mxu1 }
 0x1ac   :  { %v231_v60 = vadd.f32 %v425_v58, %v230_v59 }
 0x1ad   :  { %v507_v61 = vpop.f32.mrf.mxu1 }
 0x1ae   :  { %v234_v62 = vmax.f32 %v231_v60, 0.0 }
 0x1b0   :  { %525 = vmatmul.mubr.msk.f32.vlgmr.msra.gmra.mxu1 %vm160_vm1, %v234_v62 }
 0x270   :  { %v319_v3 = vpop.f32.mrf.mxu1 }
 0x271   :  { %v320_v5 = vadd.f32 %v427_v2, %v319_v3 }
 0x272   :  { %v526_v6 = vpop.f32.mrf.mxu1 }
 0x273   :  { %v323_v7 = vmax.f32 %v320_v5, 0.0 }
 0x275   :  { %536 = vmatmul.mubr.msk.f32.vlgmr.msra.gmra.mxu0 %vm335_vm2, %v323_v7 }
 0x335   :  { %v405_v4 = vpop.f32.mrf.mxu0 }
 0x336   :  { %v406_v9 = vadd.f32 %v429_v8, %v405_v4 }
 0x337   :  { %v537_v10 = vpop.f32.mrf.mxu0 }
 0x338   :  { %409 = vst [vmem:[#allocation2] sm:$0xff] %v406_v9 }
 0x339   :  { %552 = shalt.err (!%p549_p4)
}
 0x33a   :  { %419 = dma.vmem_to_hbm [thread:$0]  %s417_s2, 128, %s827_s9, [#allocation3]  }
 0x33b   :  { %561 = dma.done.wait [#allocation3], 128  }
 0x33c   :  { %562 = vsyncadd [#allocation3], 4294967168 }
 0x33d   :  { %423 = vsyncpa [#allocation3], 1 }

</bundles_post_ra>
